<compile_context>
chip_gen: v5e
topology: v5e:2x2
jax: 0.10.0
libtpu: 0.0.40
codegen_flags: <defaults>
</compile_context>

<pallas_src>
import functools

import jax
import jax.numpy as jnp
from jax.experimental import pallas as pl
from jax.experimental.pallas import tpu as pltpu


def _round_up(v, m):
    return ((v + m - 1) // m) * m


def _ceil_div(a, b):
    return -(-a // b)


def _pick_tiles(n, max_tile, align, min_tiles=1):
    """Adaptive tile so the padded extent stays close to n (not a full tile)."""
    n_al = _round_up(n, align)
    n_tiles = max(min_tiles, _ceil_div(n_al, max_tile))
    tile = _round_up(_ceil_div(n_al, n_tiles), align)
    return tile, n_tiles * tile


def graph_conv_kernel(a_ref, xw_ref, b_ref, o_ref, acc_ref, *, tk, xw_resident):
    k = pl.program_id(1)

    @pl.when(k == 0)
    def _():
        acc_ref[...] = jnp.zeros_like(acc_ref)

    # Cast the streamed A tile to bf16 in-kernel (hidden under the A DMA since
    # the kernel is HBM-bound); accumulate in f32 on the MXU.
    a_tile = a_ref[...].astype(jnp.bfloat16)
    if xw_resident:
        start = pl.multiple_of(k * tk, tk)
        xw_tile = xw_ref[pl.ds(start, tk), :]
    else:
        xw_tile = xw_ref[...]

    acc_ref[...] += jnp.dot(a_tile, xw_tile, preferred_element_type=jnp.float32)

    @pl.when(k == pl.num_programs(1) - 1)
    def _():
        o_ref[...] = (acc_ref[...] + b_ref[...]).astype(o_ref.dtype)


@functools.partial(jax.jit, static_argnames=("tm_max", "tk_max"))
def graph_conv(x, A, W, b, *, tm_max=1024, tk_max=2048):
    """x: (N, Cin), A: (N, N), W: (Cout, Cin), b: (Cout,) -> (N, Cout)."""
    N, _ = x.shape
    Cout = W.shape[0]
    out_dtype = x.dtype

    # --- Reassociation: cheap (N, Cin) @ (Cin, Cout) feature matmul up front.
    xw = jnp.dot(x, W.T, preferred_element_type=jnp.float32)    # (N, Cout) f32

    # --- Static adaptive tile selection -------------------------------------
    cp = _round_up(max(Cout, 128), 128)        # lane-dense output width
    # Force >= 2 row tiles for larger N so v7x's two TensorCores both work.
    row_min_tiles = 2 if _round_up(N, 8) >= 256 else 1
    tm, n_rows = _pick_tiles(N, tm_max, 8, min_tiles=row_min_tiles)
    tk, n_cols = _pick_tiles(N, tk_max, 128)

    # --- Pad only when needed; A keeps its native dtype (no cast pass). -----
    if (n_rows != N) or (n_cols != N):
        a_in = jnp.pad(A, ((0, n_rows - N), (0, n_cols - N)))
    else:
        a_in = A
    if (n_cols != N) or (cp != Cout):
        xw = jnp.pad(xw, ((0, n_cols - N), (0, cp - Cout)))
    xw_p = xw.astype(jnp.bfloat16)
    b_p = jnp.pad(b.astype(jnp.float32), (0, cp - Cout)).reshape(1, cp)

    grid = (n_rows // tm, n_cols // tk)

    # Keep the whole xw operand resident in VMEM when small; else stream tiles.
    xw_resident = (n_cols * cp * 2) <= 4 * 1024 * 1024
    if xw_resident:
        xw_spec = pl.BlockSpec((n_cols, cp), lambda i, k: (0, 0))
        xw_bytes = n_cols * cp * 2
    else:
        xw_spec = pl.BlockSpec((tk, cp), lambda i, k: (k, 0))
        xw_bytes = n_cols * cp * 2 * grid[0]

    a_itemsize = jnp.dtype(A.dtype).itemsize
    out_itemsize = jnp.dtype(out_dtype).itemsize
    cost = pl.CostEstimate(
        flops=2 * n_rows * n_cols * cp,
        transcendentals=0,
        bytes_accessed=(n_rows * n_cols * a_itemsize   # A stream (dominant)
                        + xw_bytes                     # xw (resident or streamed)
                        + cp * 4                       # bias
                        + n_rows * cp * out_itemsize), # output
    )

    kernel = functools.partial(graph_conv_kernel, tk=tk, xw_resident=xw_resident)

    out_p = pl.pallas_call(
        kernel,
        out_shape=jax.ShapeDtypeStruct((n_rows, cp), out_dtype),
        grid_spec=pltpu.PrefetchScalarGridSpec(
            num_scalar_prefetch=0,
            grid=grid,
            in_specs=[
                pl.BlockSpec((tm, tk), lambda i, k: (i, k)),   # A tile (native dtype)
                xw_spec,                                       # xw (bf16)
                pl.BlockSpec((1, cp), lambda i, k: (0, 0)),    # bias (resident)
            ],
            out_specs=pl.BlockSpec((tm, cp), lambda i, k: (i, 0)),
            scratch_shapes=[pltpu.VMEM((tm, cp), jnp.float32)],
        ),
        compiler_params=pltpu.CompilerParams(
            dimension_semantics=("parallel", "arbitrary"),
            vmem_limit_bytes=48 * 1024 * 1024,
        ),
        cost_estimate=cost,
    )(a_in, xw_p, b_p)

    if n_rows == N and cp == Cout:
        return out_p
    return out_p[:N, :Cout]


if __name__ == "__main__":
    # Small shapes consistent with the module: N nodes, Cin -> Cout features.
    N, Cin, Cout = 8, 32, 16

    key = jax.random.PRNGKey(0)
    kx, ka, kw, kb = jax.random.split(key, 4)

    x = jax.random.normal(kx, (N, Cin), dtype=jnp.float32)
    A = jax.random.normal(ka, (N, N), dtype=jnp.float32)
    # Deterministic parameter init (synthetic; shapes match nn.Linear(Cin, Cout)).
    W = jax.random.normal(kw, (Cout, Cin), dtype=jnp.float32) * 0.1
    b = jax.random.normal(kb, (Cout,), dtype=jnp.float32) * 0.1

    out = jax.block_until_ready(graph_conv(x, A, W, b))

    # Pure-JAX f32 reference of the module's math.  The kernel intentionally
    # rounds A tiles and x@W.T to bf16 (f32 accumulation), so tolerance is
    # loosened slightly.
    ref = (A @ x) @ W.T + b
    assert out.shape == (N, Cout)
    assert jnp.allclose(out, ref, atol=5e-2, rtol=5e-2)

    print("KERNEL_OK")
</pallas_src>

<mosaic_0001>
module attributes {stable_mosaic.version = 11 : i64} {
  func.func @graph_conv_kernel(%arg0: i32, %arg1: i32, %arg2: memref<8x128xf32, #tpu.memory_space<vmem>>, %arg3: memref<128x128xbf16, #tpu.memory_space<vmem>>, %arg4: memref<1x128xf32, #tpu.memory_space<vmem>>, %arg5: memref<8x128xf32, #tpu.memory_space<vmem>>, %arg6: memref<8x128xf32, #tpu.memory_space<vmem>>) attributes {dimension_semantics = [#tpu.dimension_semantics<parallel>, #tpu.dimension_semantics<arbitrary>], iteration_bounds = array<i64: 1, 1>, scalar_prefetch = 0 : i64, scratch_operands = 1 : i64, tpu.core_type = #tpu.core_type<tc>, window_params = [{transform_indices = @transform_0, window_bounds = array<i64: 8, 128>}, {pipeline_mode = #tpu.pipeline_mode<synchronous>, transform_indices = @transform_1, window_bounds = array<i64: 128, 128>}, {pipeline_mode = #tpu.pipeline_mode<synchronous>, transform_indices = @transform_2, window_bounds = array<i64: 1, 128>}, {transform_indices = @transform_3, window_bounds = array<i64: 8, 128>}]} {
    %c0_i32 = arith.constant 0 : i32
    %0 = arith.cmpi eq, %arg1, %c0_i32 : i32
    %1 = arith.extui %0 : i1 to i32
    %c0_i32_0 = arith.constant 0 : i32
    %2 = arith.cmpi ne, %1, %c0_i32_0 : i32
    scf.if %2 {
      %cst_9 = arith.constant 0.000000e+00 : f32
      %16 = vector.broadcast %cst_9 : f32 to vector<8x128xf32>
      %c0_10 = arith.constant 0 : index
      %c0_11 = arith.constant 0 : index
      %17 = vector.load %arg6[%c0_10, %c0_11] : memref<8x128xf32, #tpu.memory_space<vmem>>, vector<8x128xf32>
      tpu.vector_store %arg6[%c0_10, %c0_11], %16 {strides = array<i32>} : memref<8x128xf32, #tpu.memory_space<vmem>>, vector<8x128xf32>,
    } else {
    }
    %c0 = arith.constant 0 : index
    %c0_1 = arith.constant 0 : index
    %3 = vector.load %arg2[%c0, %c0_1] : memref<8x128xf32, #tpu.memory_space<vmem>>, vector<8x128xf32>
    %4 = arith.truncf %3 : vector<8x128xf32> to vector<8x128xbf16>
    %c128_i32 = arith.constant 128 : i32
    %5 = arith.muli %arg1, %c128_i32 : i32
    %6 = tpu.assume_multiple %5, 128 : i32
    %7 = arith.index_cast %6 : i32 to index
    %c0_2 = arith.constant 0 : index
    %8 = vector.load %arg3[%7, %c0_2] : memref<128x128xbf16, #tpu.memory_space<vmem>>, vector<128x128xbf16>
    %c0_3 = arith.constant 0 : index
    %c0_4 = arith.constant 0 : index
    %9 = vector.load %arg6[%c0_3, %c0_4] : memref<8x128xf32, #tpu.memory_space<vmem>>, vector<8x128xf32>
    %cst = arith.constant dense<0.000000e+00> : vector<8x128xf32>
    %10 = tpu.matmul %4, %8, %cst {dimension_numbers = #tpu.dot_dimension_numbers<[1], [0], [0], [1], [0, 0, 1, 1], [], []>} : vector<8x128xbf16>, vector<128x128xbf16>, vector<8x128xf32> -> vector<8x128xf32>
    %11 = arith.addf %9, %10 : vector<8x128xf32>
    %c0_5 = arith.constant 0 : index
    %c0_6 = arith.constant 0 : index
    %12 = vector.load %arg6[%c0_5, %c0_6] : memref<8x128xf32, #tpu.memory_space<vmem>>, vector<8x128xf32>
    tpu.vector_store %arg6[%c0_5, %c0_6], %11 {strides = array<i32>} : memref<8x128xf32, #tpu.memory_space<vmem>>, vector<8x128xf32>,
    %c0_i32_7 = arith.constant 0 : i32
    %13 = arith.cmpi eq, %arg1, %c0_i32_7 : i32
    %14 = arith.extui %13 : i1 to i32
    %c0_i32_8 = arith.constant 0 : i32
    %15 = arith.cmpi ne, %14, %c0_i32_8 : i32
    scf.if %15 {
      %c0_9 = arith.constant 0 : index
      %c0_10 = arith.constant 0 : index
      %16 = vector.load %arg6[%c0_9, %c0_10] : memref<8x128xf32, #tpu.memory_space<vmem>>, vector<8x128xf32>
      %c0_11 = arith.constant 0 : index
      %c0_12 = arith.constant 0 : index
      %17 = vector.load %arg4[%c0_11, %c0_12] : memref<1x128xf32, #tpu.memory_space<vmem>>, vector<1x128xf32>
      %18 = vector.broadcast %17 : vector<1x128xf32> to vector<8x128xf32>
      %19 = arith.addf %16, %18 : vector<8x128xf32>
      %c0_13 = arith.constant 0 : index
      %c0_14 = arith.constant 0 : index
      %20 = vector.load %arg5[%c0_13, %c0_14] : memref<8x128xf32, #tpu.memory_space<vmem>>, vector<8x128xf32>
      tpu.vector_store %arg5[%c0_13, %c0_14], %19 {strides = array<i32>} : memref<8x128xf32, #tpu.memory_space<vmem>>, vector<8x128xf32>,
    } else {
    }
    return
  }
  func.func @transform_0(%arg0: i32, %arg1: i32) -> (i32, i32) {
    %c0_i32 = arith.constant 0 : i32
    return %arg0, %arg1 : i32, i32
  }
  func.func @transform_1(%arg0: i32, %arg1: i32) -> (i32, i32) {
    %c0_i32 = arith.constant 0 : i32
    %c0_i32_0 = arith.constant 0 : i32
    %c0_i32_1 = arith.constant 0 : i32
    return %c0_i32, %c0_i32_0 : i32, i32
  }
  func.func @transform_2(%arg0: i32, %arg1: i32) -> (i32, i32) {
    %c0_i32 = arith.constant 0 : i32
    %c0_i32_0 = arith.constant 0 : i32
    %c0_i32_1 = arith.constant 0 : i32
    return %c0_i32, %c0_i32_0 : i32, i32
  }
  func.func @transform_3(%arg0: i32, %arg1: i32) -> (i32, i32) {
    %c0_i32 = arith.constant 0 : i32
    %c0_i32_0 = arith.constant 0 : i32
    return %arg0, %c0_i32 : i32, i32
  }
}

</mosaic_0001>

<bundles_post_ra>
// kernel: graph_conv.1
= control target key start
LH: loop header
LB: loop body
LE: loop exit
PB: predicated region body
PF: predicated region fallthrough
CT: control target
= control target key end

     0   :  { %s257_s0 = inlined_call_operand.vmem [shape: f32[8,128], index: 0, kind: input, shape index: {}]   ;;  %s258_s1 = inlined_call_operand.vmem [shape: bf16[128,128], index: 1, kind: input, shape index: {}]   ;;  %s259_s2 = inlined_call_operand.vmem [shape: f32[1,128], index: 2, kind: input, shape index: {}]   ;;  %s260_s3 = inlined_call_operand.hbm [shape: f32[8,128], index: 3, kind: output, shape index: {}]  }
   0x1   :  { %v174_v0 = vld [vmem:[%s258_s1 + $0x38] sm:$0xff]  ;;  %v173_v1 = vld [vmem:[%s258_s1 + $0x30] sm:$0xff] }
   0x2   :  { %92 = vmatpush.bf16.msra.mxu0 %v174_v0 }
   0x3   :  { %8 = vsyncpa [#allocation4], 0  ;;  %v172_v2 = vld [vmem:[%s258_s1 + $0x28] sm:$0xff]  ;;  %v171_v3 = vld [vmem:[%s258_s1 + $0x20] sm:$0xff]  ;;  %s203_s5 = smov [#allocation3]   ;;  %s124_s9 = sshll.u32 %s260_s3, 4  ;;  %s125_s9 = int_to_ptr.hbm [resolvable:$true] %s124_s9 }
   0x4   :  { %v170_v4 = vld [vmem:[%s258_s1 + $0x18] sm:$0xff]  ;;  %v169_v5 = vld [vmem:[%s258_s1 + $0x10] sm:$0xff]  ;;  %v168_v6 = vld [vmem:[%s258_s1 + $0x8] sm:$0xff]  ;;  %s122_s6 = sshll.u32 %s203_s5, 4  ;;  %s123_s6 = int_to_ptr.vmem [resolvable:$true] %s122_s6 }
   0x5   :  { %v167_v7 = vld [vmem:[%s258_s1] sm:$0xff] }
   0x6   :  { %93 = vmatpush.bf16.msra.mxu0 %v173_v1  ;;  %v20_v8 = vld [vmem:[%s257_s0] sm:$0xff] }
   0x7   :  { %v21_v9 = vpack.c.bf16 %v20_v8, %v20_v8  ;;  %v176_v10 = vld [vmem:[%s259_s2] ss:$0 sm:$0xff] }
   0xa   :  { %94 = vmatpush.bf16.msra.mxu0 %v172_v2 }
   0xe   :  { %95 = vmatpush.bf16.msra.mxu0 %v171_v3 }
  0x12   :  { %96 = vmatpush.bf16.msra.mxu0 %v170_v4 }
  0x16   :  { %97 = vmatpush.bf16.msra.mxu0 %v169_v5 }
  0x1a   :  { %98 = vmatpush.bf16.msra.mxu0 %v168_v6 }
  0x1e   :  { %99 = vmatpush.bf16.msra.mxu0 %v167_v7 }
  0x21   :  { %100 = vmatmul.bf16.vlgmr.msra.gmra.mxu0 %v21_v9 }
  0x9e   :  { %v101_v11 = vpop.f32.mrf.mxu0 }
  0x9f   :  { %v115_v12 = vadd.f32 %v176_v10, %v101_v11 }
  0xa1   :  { %116 = vst [vmem:[#allocation3] sm:$0xff] %v115_v12 }
  0xa2   :  { %127 = dma.vmem_to_hbm [thread:$0]  %s123_s6, 128, %s125_s9, [#allocation4]  }
  0xa6   :  { %v103_v13 = vpop.f32.mrf.mxu0 }
  0xa7   :  { %201 = dma.done.wait [#allocation4], 128  }
  0xa8   :  { %202 = vsyncadd [#allocation4], 4294967168 }
  0xa9   :  { %132 = vsyncpa [#allocation4], 1 }

</bundles_post_ra>
